<compile_context>
chip_gen: v5e
topology: v5e:2x2
jax: 0.10.0
libtpu: 0.0.40
codegen_flags: <defaults>
</compile_context>

<pallas_src>
import jax
import jax.numpy as jnp
from jax.experimental import pallas as pl
from jax.experimental.pallas import tpu as pltpu

# Synthetic env dimensions (Env() is not available; pick small consistent sizes)
NUM_STATE = 16    # env.n_observations
NUM_ACTION = 8    # env.node_num
HIDDEN = (128, 64, 32)


def _round_up(n, m):
    return ((n + m - 1) // m) * m


def _leaky_relu(x, slope=0.01):
    return jnp.where(x > 0, x, slope * x)


def actor_kernel(x_ref,
                 w1_ref, b1_ref,
                 w2_ref, b2_ref,
                 w3_ref, b3_ref,
                 w4_ref, b4_ref,
                 out_ref):
    x = x_ref[...].astype(jnp.float32)

    def dense(h, w_ref, b_ref):
        # bf16 MXU operands, f32 accumulation; bias add + activations stay f32.
        return jnp.dot(h.astype(jnp.bfloat16),
                       w_ref[...].astype(jnp.bfloat16),
                       preferred_element_type=jnp.float32) + b_ref[...]

    h = _leaky_relu(dense(x, w1_ref, b1_ref))
    h = _leaky_relu(dense(h, w2_ref, b2_ref))
    h = _leaky_relu(dense(h, w3_ref, b3_ref))
    logits = dense(h, w4_ref, b4_ref)

    # softmax over the action (last) axis, in float32 (matches dtype=torch.float)
    m = jnp.max(logits, axis=-1, keepdims=True)
    e = jnp.exp(logits - m)
    denom = jnp.sum(e, axis=-1, keepdims=True)
    out_ref[...] = e * pl.reciprocal(denom, approx=True)


def actor_forward(x, params, *, batch_tile=256):
    """x: [B, NUM_STATE] float32 -> action_prob: [B, NUM_ACTION] float32."""
    (w1, b1), (w2, b2), (w3, b3), (w4, b4) = params
    B = x.shape[0]

    # Sublane-aligned batch tile; pad B up to a tile multiple (padded rows are
    # zeros -> a harmless row-wise softmax, sliced off below).
    tb = min(batch_tile, _round_up(B, 8))
    tb = _round_up(tb, 8)
    Bp = _round_up(B, tb)
    if Bp != B:
        x = jnp.pad(x, ((0, Bp - B), (0, 0)))
    grid = (Bp // tb,)

    x_spec = pl.BlockSpec((tb, NUM_STATE), lambda i: (i, 0))
    out_spec = pl.BlockSpec((tb, NUM_ACTION), lambda i: (i, 0))

    def const_spec(arr):
        # Whole array, same block every grid step -> weights stay VMEM-resident.
        return pl.BlockSpec(arr.shape, lambda i: (0, 0))

    dims = (NUM_STATE,) + HIDDEN + (NUM_ACTION,)
    flops = 2 * Bp * sum(dims[i] * dims[i + 1] for i in range(len(dims) - 1))
    param_bytes = sum(int(w.size) * 4 + int(b.size) * 4 for (w, b) in params)
    cost = pl.CostEstimate(
        flops=int(flops),
        transcendentals=int(Bp * (NUM_ACTION + 1)),      # exp + approx reciprocal
        bytes_accessed=int(Bp * (NUM_STATE + NUM_ACTION) * 4 + param_bytes),
    )

    out = pl.pallas_call(
        actor_kernel,
        grid=grid,
        out_shape=jax.ShapeDtypeStruct((Bp, NUM_ACTION), jnp.float32),
        in_specs=[x_spec,
                  const_spec(w1), const_spec(b1),
                  const_spec(w2), const_spec(b2),
                  const_spec(w3), const_spec(b3),
                  const_spec(w4), const_spec(b4)],
        out_specs=out_spec,
        compiler_params=pltpu.CompilerParams(
            dimension_semantics=("parallel",)),   # shards batch grid over v7x's 2 TCs
        cost_estimate=cost,
    )(x, w1, b1, w2, b2, w3, b3, w4, b4)
    return out[:B]


def init_params(key):
    """Deterministic Kaiming-uniform-ish init matching nn.Linear shapes."""
    dims = (NUM_STATE,) + HIDDEN + (NUM_ACTION,)
    params = []
    for i in range(len(dims) - 1):
        fan_in, fan_out = dims[i], dims[i + 1]
        key, kw, kb = jax.random.split(key, 3)
        bound = 1.0 / jnp.sqrt(fan_in)
        # stored as (in, out) so the kernel does x @ W
        w = jax.random.uniform(kw, (fan_in, fan_out), jnp.float32, -bound, bound)
        b = jax.random.uniform(kb, (1, fan_out), jnp.float32, -bound, bound)
        params.append((w, b))
    return params


def actor_reference(x, params):
    """Pure-JAX f32 reference for correctness checking."""
    h = x
    for i, (w, b) in enumerate(params):
        h = h @ w + b
        if i < len(params) - 1:
            h = _leaky_relu(h)
    return jax.nn.softmax(h, axis=1)


if __name__ == "__main__":
    key = jax.random.PRNGKey(0)
    key, kx = jax.random.split(key)

    # Small shapes: B=40 with a 16-row tile -> exercises padding + a 3-step grid.
    B = 40
    x = jax.random.normal(kx, (B, NUM_STATE), jnp.float32)
    params = init_params(key)

    out = actor_forward(x, params, batch_tile=16)
    out = jax.block_until_ready(out)

    ref = actor_reference(x, params)
    assert out.shape == (B, NUM_ACTION)
    # approx reciprocal + bf16 MXU operands -> slightly looser tolerances than f32.
    assert jnp.allclose(jnp.sum(out, axis=1), 1.0, atol=5e-3)
    assert jnp.allclose(out, ref, atol=2e-2, rtol=2e-2)

    print("KERNEL_OK")
</pallas_src>

<mosaic_0001>
module attributes {stable_mosaic.version = 11 : i64} {
  func.func @actor_kernel(%arg0: i32, %arg1: memref<16x16xf32, #tpu.memory_space<vmem>>, %arg2: memref<16x128xf32, #tpu.memory_space<vmem>>, %arg3: memref<1x128xf32, #tpu.memory_space<vmem>>, %arg4: memref<128x64xf32, #tpu.memory_space<vmem>>, %arg5: memref<1x64xf32, #tpu.memory_space<vmem>>, %arg6: memref<64x32xf32, #tpu.memory_space<vmem>>, %arg7: memref<1x32xf32, #tpu.memory_space<vmem>>, %arg8: memref<32x8xf32, #tpu.memory_space<vmem>>, %arg9: memref<1x8xf32, #tpu.memory_space<vmem>>, %arg10: memref<16x8xf32, #tpu.memory_space<vmem>>) attributes {dimension_semantics = [#tpu.dimension_semantics<parallel>], iteration_bounds = array<i64: 3>, scalar_prefetch = 0 : i64, scratch_operands = 0 : i64, tpu.core_type = #tpu.core_type<tc>, window_params = [{transform_indices = @transform_0, window_bounds = array<i64: 16, 16>}, {pipeline_mode = #tpu.pipeline_mode<synchronous>, transform_indices = @transform_1, window_bounds = array<i64: 16, 128>}, {pipeline_mode = #tpu.pipeline_mode<synchronous>, transform_indices = @transform_2, window_bounds = array<i64: 1, 128>}, {pipeline_mode = #tpu.pipeline_mode<synchronous>, transform_indices = @transform_3, window_bounds = array<i64: 128, 64>}, {pipeline_mode = #tpu.pipeline_mode<synchronous>, transform_indices = @transform_4, window_bounds = array<i64: 1, 64>}, {pipeline_mode = #tpu.pipeline_mode<synchronous>, transform_indices = @transform_5, window_bounds = array<i64: 64, 32>}, {pipeline_mode = #tpu.pipeline_mode<synchronous>, transform_indices = @transform_6, window_bounds = array<i64: 1, 32>}, {pipeline_mode = #tpu.pipeline_mode<synchronous>, transform_indices = @transform_7, window_bounds = array<i64: 32, 8>}, {pipeline_mode = #tpu.pipeline_mode<synchronous>, transform_indices = @transform_8, window_bounds = array<i64: 1, 8>}, {transform_indices = @transform_9, window_bounds = array<i64: 16, 8>}]} {
    %c0 = arith.constant 0 : index
    %c0_0 = arith.constant 0 : index
    %0 = vector.load %arg1[%c0, %c0_0] : memref<16x16xf32, #tpu.memory_space<vmem>>, vector<16x16xf32>
    %1 = arith.truncf %0 : vector<16x16xf32> to vector<16x16xbf16>
    %c0_1 = arith.constant 0 : index
    %c0_2 = arith.constant 0 : index
    %2 = vector.load %arg2[%c0_1, %c0_2] : memref<16x128xf32, #tpu.memory_space<vmem>>, vector<16x128xf32>
    %3 = arith.truncf %2 : vector<16x128xf32> to vector<16x128xbf16>
    %cst = arith.constant dense<0.000000e+00> : vector<16x128xf32>
    %4 = tpu.matmul %1, %3, %cst {dimension_numbers = #tpu.dot_dimension_numbers<[1], [0], [0], [1], [0, 0, 1, 1], [], []>} : vector<16x16xbf16>, vector<16x128xbf16>, vector<16x128xf32> -> vector<16x128xf32>
    %c0_3 = arith.constant 0 : index
    %c0_4 = arith.constant 0 : index
    %5 = vector.load %arg3[%c0_3, %c0_4] : memref<1x128xf32, #tpu.memory_space<vmem>>, vector<1x128xf32>
    %6 = vector.broadcast %5 : vector<1x128xf32> to vector<16x128xf32>
    %7 = arith.addf %4, %6 : vector<16x128xf32>
    %cst_5 = arith.constant 0.000000e+00 : f32
    %8 = vector.broadcast %cst_5 : f32 to vector<16x128xf32>
    %9 = arith.cmpf ogt, %7, %8 : vector<16x128xf32>
    %cst_6 = arith.constant 0.00999999977 : f32
    %10 = vector.broadcast %cst_6 : f32 to vector<16x128xf32>
    %11 = arith.mulf %10, %7 : vector<16x128xf32>
    %12 = arith.select %9, %7, %11 : vector<16x128xi1>, vector<16x128xf32>
    %13 = arith.truncf %12 : vector<16x128xf32> to vector<16x128xbf16>
    %c0_7 = arith.constant 0 : index
    %c0_8 = arith.constant 0 : index
    %14 = vector.load %arg4[%c0_7, %c0_8] : memref<128x64xf32, #tpu.memory_space<vmem>>, vector<128x64xf32>
    %15 = arith.truncf %14 : vector<128x64xf32> to vector<128x64xbf16>
    %cst_9 = arith.constant dense<0.000000e+00> : vector<16x64xf32>
    %16 = tpu.matmul %13, %15, %cst_9 {dimension_numbers = #tpu.dot_dimension_numbers<[1], [0], [0], [1], [0, 0, 1, 1], [], []>} : vector<16x128xbf16>, vector<128x64xbf16>, vector<16x64xf32> -> vector<16x64xf32>
    %c0_10 = arith.constant 0 : index
    %c0_11 = arith.constant 0 : index
    %17 = vector.load %arg5[%c0_10, %c0_11] : memref<1x64xf32, #tpu.memory_space<vmem>>, vector<1x64xf32>
    %18 = vector.broadcast %17 : vector<1x64xf32> to vector<16x64xf32>
    %19 = arith.addf %16, %18 : vector<16x64xf32>
    %cst_12 = arith.constant 0.000000e+00 : f32
    %20 = vector.broadcast %cst_12 : f32 to vector<16x64xf32>
    %21 = arith.cmpf ogt, %19, %20 : vector<16x64xf32>
    %cst_13 = arith.constant 0.00999999977 : f32
    %22 = vector.broadcast %cst_13 : f32 to vector<16x64xf32>
    %23 = arith.mulf %22, %19 : vector<16x64xf32>
    %24 = arith.select %21, %19, %23 : vector<16x64xi1>, vector<16x64xf32>
    %25 = arith.truncf %24 : vector<16x64xf32> to vector<16x64xbf16>
    %c0_14 = arith.constant 0 : index
    %c0_15 = arith.constant 0 : index
    %26 = vector.load %arg6[%c0_14, %c0_15] : memref<64x32xf32, #tpu.memory_space<vmem>>, vector<64x32xf32>
    %27 = arith.truncf %26 : vector<64x32xf32> to vector<64x32xbf16>
    %cst_16 = arith.constant dense<0.000000e+00> : vector<16x32xf32>
    %28 = tpu.matmul %25, %27, %cst_16 {dimension_numbers = #tpu.dot_dimension_numbers<[1], [0], [0], [1], [0, 0, 1, 1], [], []>} : vector<16x64xbf16>, vector<64x32xbf16>, vector<16x32xf32> -> vector<16x32xf32>
    %c0_17 = arith.constant 0 : index
    %c0_18 = arith.constant 0 : index
    %29 = vector.load %arg7[%c0_17, %c0_18] : memref<1x32xf32, #tpu.memory_space<vmem>>, vector<1x32xf32>
    %30 = vector.broadcast %29 : vector<1x32xf32> to vector<16x32xf32>
    %31 = arith.addf %28, %30 : vector<16x32xf32>
    %cst_19 = arith.constant 0.000000e+00 : f32
    %32 = vector.broadcast %cst_19 : f32 to vector<16x32xf32>
    %33 = arith.cmpf ogt, %31, %32 : vector<16x32xf32>
    %cst_20 = arith.constant 0.00999999977 : f32
    %34 = vector.broadcast %cst_20 : f32 to vector<16x32xf32>
    %35 = arith.mulf %34, %31 : vector<16x32xf32>
    %36 = arith.select %33, %31, %35 : vector<16x32xi1>, vector<16x32xf32>
    %37 = arith.truncf %36 : vector<16x32xf32> to vector<16x32xbf16>
    %c0_21 = arith.constant 0 : index
    %c0_22 = arith.constant 0 : index
    %38 = vector.load %arg8[%c0_21, %c0_22] : memref<32x8xf32, #tpu.memory_space<vmem>>, vector<32x8xf32>
    %39 = arith.truncf %38 : vector<32x8xf32> to vector<32x8xbf16>
    %cst_23 = arith.constant dense<0.000000e+00> : vector<16x8xf32>
    %40 = tpu.matmul %37, %39, %cst_23 {dimension_numbers = #tpu.dot_dimension_numbers<[1], [0], [0], [1], [0, 0, 1, 1], [], []>} : vector<16x32xbf16>, vector<32x8xbf16>, vector<16x8xf32> -> vector<16x8xf32>
    %c0_24 = arith.constant 0 : index
    %c0_25 = arith.constant 0 : index
    %41 = vector.load %arg9[%c0_24, %c0_25] : memref<1x8xf32, #tpu.memory_space<vmem>>, vector<1x8xf32>
    %42 = vector.broadcast %41 : vector<1x8xf32> to vector<16x8xf32>
    %43 = arith.addf %40, %42 : vector<16x8xf32>
    %cst_26 = arith.constant dense<0xFF800000> : vector<16xf32>
    %44 = vector.multi_reduction <maximumf>, %43, %cst_26 [1] : vector<16x8xf32> to vector<16xf32>
    %45 = vector.shape_cast %44 : vector<16xf32> to vector<16x1xf32>
    %46 = vector.broadcast %45 : vector<16x1xf32> to vector<16x8xf32>
    %47 = arith.subf %43, %46 : vector<16x8xf32>
    %48 = math.exp %47 : vector<16x8xf32>
    %cst_27 = arith.constant dense<0.000000e+00> : vector<16xf32>
    %49 = vector.multi_reduction <add>, %48, %cst_27 [1] : vector<16x8xf32> to vector<16xf32>
    %50 = vector.shape_cast %49 : vector<16xf32> to vector<16x1xf32>
    %51 = tpu.reciprocal %50 {approx = true} : vector<16x1xf32> -> vector<16x1xf32>
    %52 = vector.broadcast %51 : vector<16x1xf32> to vector<16x8xf32>
    %53 = arith.mulf %48, %52 : vector<16x8xf32>
    %c0_28 = arith.constant 0 : index
    %c0_29 = arith.constant 0 : index
    %54 = vector.load %arg10[%c0_28, %c0_29] : memref<16x8xf32, #tpu.memory_space<vmem>>, vector<16x8xf32>
    tpu.vector_store %arg10[%c0_28, %c0_29], %53 {strides = array<i32>} : memref<16x8xf32, #tpu.memory_space<vmem>>, vector<16x8xf32>,
    return
  }
  func.func @transform_0(%arg0: i32) -> (i32, i32) {
    %c0_i32 = arith.constant 0 : i32
    %c0_i32_0 = arith.constant 0 : i32
    return %arg0, %c0_i32 : i32, i32
  }
  func.func @transform_1(%arg0: i32) -> (i32, i32) {
    %c0_i32 = arith.constant 0 : i32
    %c0_i32_0 = arith.constant 0 : i32
    %c0_i32_1 = arith.constant 0 : i32
    return %c0_i32, %c0_i32_0 : i32, i32
  }
  func.func @transform_2(%arg0: i32) -> (i32, i32) {
    %c0_i32 = arith.constant 0 : i32
    %c0_i32_0 = arith.constant 0 : i32
    %c0_i32_1 = arith.constant 0 : i32
    return %c0_i32, %c0_i32_0 : i32, i32
  }
  func.func @transform_3(%arg0: i32) -> (i32, i32) {
    %c0_i32 = arith.constant 0 : i32
    %c0_i32_0 = arith.constant 0 : i32
    %c0_i32_1 = arith.constant 0 : i32
    return %c0_i32, %c0_i32_0 : i32, i32
  }
  func.func @transform_4(%arg0: i32) -> (i32, i32) {
    %c0_i32 = arith.constant 0 : i32
    %c0_i32_0 = arith.constant 0 : i32
    %c0_i32_1 = arith.constant 0 : i32
    return %c0_i32, %c0_i32_0 : i32, i32
  }
  func.func @transform_5(%arg0: i32) -> (i32, i32) {
    %c0_i32 = arith.constant 0 : i32
    %c0_i32_0 = arith.constant 0 : i32
    %c0_i32_1 = arith.constant 0 : i32
    return %c0_i32, %c0_i32_0 : i32, i32
  }
  func.func @transform_6(%arg0: i32) -> (i32, i32) {
    %c0_i32 = arith.constant 0 : i32
    %c0_i32_0 = arith.constant 0 : i32
    %c0_i32_1 = arith.constant 0 : i32
    return %c0_i32, %c0_i32_0 : i32, i32
  }
  func.func @transform_7(%arg0: i32) -> (i32, i32) {
    %c0_i32 = arith.constant 0 : i32
    %c0_i32_0 = arith.constant 0 : i32
    %c0_i32_1 = arith.constant 0 : i32
    return %c0_i32, %c0_i32_0 : i32, i32
  }
  func.func @transform_8(%arg0: i32) -> (i32, i32) {
    %c0_i32 = arith.constant 0 : i32
    %c0_i32_0 = arith.constant 0 : i32
    %c0_i32_1 = arith.constant 0 : i32
    return %c0_i32, %c0_i32_0 : i32, i32
  }
  func.func @transform_9(%arg0: i32) -> (i32, i32) {
    %c0_i32 = arith.constant 0 : i32
    %c0_i32_0 = arith.constant 0 : i32
    return %arg0, %c0_i32 : i32, i32
  }
}

</mosaic_0001>

<bundles_post_ra>
// kernel: tpu_custom_call.1
= control target key start
LH: loop header
LB: loop body
LE: loop exit
PB: predicated region body
PF: predicated region fallthrough
CT: control target
= control target key end

     0   :  { %s663_s30 = smov 0   ;;  %s795_s0 = inlined_call_operand.vmem [shape: f32[48,16], index: 0, kind: input, shape index: {}]   ;;  %s796_s1 = inlined_call_operand.vmem [shape: f32[16,128], index: 1, kind: input, shape index: {}]   ;;  %s797_s2 = inlined_call_operand.vmem [shape: f32[1,128], index: 2, kind: input, shape index: {}]   ;;  %s798_s3 = inlined_call_operand.vmem [shape: f32[128,64], index: 3, kind: input, shape index: {}]   ;;  %s799_s4 = inlined_call_operand.vmem [shape: f32[1,64], index: 4, kind: input, shape index: {}]   ;;  %s800_s5 = inlined_call_operand.vmem [shape: f32[64,32], index: 5, kind: input, shape index: {}]   ;;  %s801_s6 = inlined_call_operand.vmem [shape: f32[1,32], index: 6, kind: input, shape index: {}]   ;;  %s802_s7 = inlined_call_operand.vmem [shape: f32[32,8], index: 7, kind: input, shape index: {}]   ;;  %s803_s8 = inlined_call_operand.vmem [shape: f32[1,8], index: 8, kind: input, shape index: {}]   ;;  %s804_s9 = inlined_call_operand.vmem [shape: f32[48,8], index: 9, kind: output, shape index: {}]  }
   0x1 LB: > { %s571_s10 = sadd.s32 4294967295, %s611_s30   ;;  %p575_p0 = scmp.ge.s32.totalorder %s611_s30, 1  ;;  %s611_s30 = sphi %s663_s30, %s19_s30  }
   0x2   : > { %p288_p1 = scmp.lt.s32.totalorder %s611_s30, 4 }
   0x4   : > { %p289_p2 = pnand %p575_p0, %p288_p1 }
   0x5   : > { %s576_s15 = sshll.u32 (!%p289_p2), %s571_s10, 1 }
   0x6   : > { %292 = sbr.rel (%p289_p2) target bundleno = 843 (0x34b), region = 56  ;;  %p325_p3 = scmp.lt.s32.totalorder (!%p289_p2), %s576_s15, 5 }
   0xb   : > { %v340_v0 = vld [vmem:[%s796_s1] sm:$0xff]  ;;  %v341_v1 = vld [vmem:[%s796_s1 + $0x8] sm:$0xff]  ;;  %v386_v2 = vld [vmem:[%s798_s3 + $0x70] sm:$0xff]  ;;  %s806_s15 = smov (!%p325_p3, %s576_s15), 5  ;;  %vm347_vm0 = vcmask 130048   ;;  %vm437_vm5 = vcmask 523264  }
   0xc   : > { %v342_v3 = vpack.c.bf16 %v341_v1, %v340_v0  ;;  %v387_v4 = vld [vmem:[%s798_s3 + $0x78] sm:$0xff]  ;;  %v384_v5 = vld [vmem:[%s798_s3 + $0x60] sm:$0xff]  ;;  %v385_v6 = vld [vmem:[%s798_s3 + $0x68] sm:$0xff]  ;;  %s577_s24 = sshll.u32 %s806_s15, 3  ;;  %vm472_vm8 = vcmask 261120   ;;  %vm490_vm9 = vcmask 64512  }
   0xd   : > { %v395_v7 = vpack.c.bf16 %v387_v4, %v386_v2  ;;  %v394_v8 = vpack.c.bf16 %v385_v6, %v384_v5  ;;  %v382_v9 = vld [vmem:[%s798_s3 + $0x50] sm:$0xff]  ;;  %v383_v10 = vld [vmem:[%s798_s3 + $0x58] sm:$0xff]  ;;  %s328_s11 = scalar_lea.vmem %s795_s0, %s577_s24  ;;  %v380_v15 = vld [vmem:[%s798_s3 + $0x40] sm:$0xff]  ;;  %s334_s12 = scalar_lea.vmem %s804_s9, %s577_s24 }
   0xe   : > { %358 = vmatpush.bf16.msra.mxu0 %v342_v3  ;;  %v337_v11 = vld [vmem:[%s328_s11] sm:$0xff]  ;;  %v338_v12 = vld [vmem:[%s328_s11 + $0x8] sm:$0xff]  ;;  %v393_v14 = vpack.c.bf16 %v383_v10, %v382_v9  ;;  %v378_v18 = vld [vmem:[%s798_s3 + $0x30] sm:$0xff] }
   0xf   : > { %400 = vmatpush.bf16.msra.mxu1 %v395_v7  ;;  %v339_v13 = vpack.c.bf16 %v338_v12, %v337_v11  ;;  %v381_v16 = vld [vmem:[%s798_s3 + $0x48] sm:$0xff]  ;;  %v379_v19 = vld [vmem:[%s798_s3 + $0x38] sm:$0xff]  ;;  %v376_v21 = vld [vmem:[%s798_s3 + $0x20] sm:$0xff] }
  0x10   : > { %v392_v17 = vpack.c.bf16 %v381_v16, %v380_v15  ;;  %v391_v20 = vpack.c.bf16 %v379_v19, %v378_v18  ;;  %v377_v22 = vld [vmem:[%s798_s3 + $0x28] sm:$0xff]  ;;  %v374_v24 = vld [vmem:[%s798_s3 + $0x10] sm:$0xff]  ;;  %v375_v25 = vld [vmem:[%s798_s3 + $0x18] sm:$0xff] }
  0x11   : > { %580 = vmatmul.msk.bf16.vlgmr.msra.gmra.mxu0 %vm347_vm0, %v339_v13  ;;  %v390_v23 = vpack.c.bf16 %v377_v22, %v376_v21  ;;  %v389_v26 = vpack.c.bf16 %v375_v25, %v374_v24  ;;  %v372_v27 = vld [vmem:[%s798_s3] sm:$0xff]  ;;  %v373_v28 = vld [vmem:[%s798_s3 + $0x8] sm:$0xff]  ;;  %v427_v40 = vld [vmem:[%s800_s5 + $0x30] sm:$0xff] }
  0x12   : > { %v388_v29 = vpack.c.bf16 %v373_v28, %v372_v27  ;;  %v593_v31 = vld [vmem:[%s797_s2] ss:$0 sm:$0xff]  ;;  %v428_v41 = vld [vmem:[%s800_s5 + $0x38] sm:$0xff]  ;;  %v426_v44 = vld [vmem:[%s800_s5 + $0x28] sm:$0xff] }
  0x13   : > { %401 = vmatpush.bf16.msra.mxu1 %v394_v8  ;;  %v432_v42 = vpack.c.bf16 %v428_v41, %v427_v40  ;;  %v425_v43 = vld [vmem:[%s800_s5 + $0x20] sm:$0xff]  ;;  %v423_v46 = vld [vmem:[%s800_s5 + $0x10] sm:$0xff]  ;;  %v424_v47 = vld [vmem:[%s800_s5 + $0x18] sm:$0xff] }
  0x14   : > { %v431_v45 = vpack.c.bf16 %v426_v44, %v425_v43  ;;  %v430_v48 = vpack.c.bf16 %v424_v47, %v423_v46  ;;  %v421_v49 = vld [vmem:[%s800_s5] sm:$0xff]  ;;  %v422_v50 = vld [vmem:[%s800_s5 + $0x8] sm:$0xff]  ;;  %v464_v62 = vld [vmem:[%s802_s7 + $0x10] sm:$0xff] }
  0x15   : > { %445 = vmatpush.bf16.msra.mxu2 %v432_v42  ;;  %v429_v51 = vpack.c.bf16 %v422_v50, %v421_v49  ;;  %v594_v53 = vld [vmem:[%s799_s4] ss:$0 sm:$0xff]  ;;  %v465_v63 = vld [vmem:[%s802_s7 + $0x18] sm:$0xff]  ;;  %v463_v2 = vld [vmem:[%s802_s7 + $0x8] sm:$0xff] }
  0x16   : > { %v467_v0 = vpack.c.bf16 %v465_v63, %v464_v62  ;;  %v462_v1 = vld [vmem:[%s802_s7] sm:$0xff] }
  0x17   : > { %402 = vmatpush.bf16.msra.mxu1 %v393_v14  ;;  %v466_v3 = vpack.c.bf16 %v463_v2, %v462_v1  ;;  %v595_v5 = vld [vmem:[%s801_s6] ss:$0 sm:$0xff] }
  0x18   : > { %482 = vmatpush.bf16.msra.mxu3 %v467_v0  ;;  %v596_v14 = vld [vmem:[%s803_s8] ss:$0 sm:$0xff] }
  0x19   : > { %446 = vmatpush.bf16.msra.mxu2 %v431_v45 }
  0x1b   : > { %403 = vmatpush.bf16.msra.mxu1 %v392_v17 }
  0x1c   : > { %483 = vmatpush.bf16.msra.mxu3 %v466_v3 }
  0x1d   : > { %447 = vmatpush.bf16.msra.mxu2 %v430_v48 }
  0x1f   : > { %404 = vmatpush.bf16.msra.mxu1 %v391_v20 }
  0x21   : > { %448 = vmatpush.bf16.msra.mxu2 %v429_v51 }
  0x23   : > { %405 = vmatpush.bf16.msra.mxu1 %v390_v23 }
  0x27   : > { %406 = vmatpush.bf16.msra.mxu1 %v389_v26 }
  0x2b   : > { %407 = vmatpush.bf16.msra.mxu1 %v388_v29 }
  0x8e   : > { %v360_v30 = vpop.f32.mrf.mxu0 }
  0x8f   : > { %v361_v32 = vadd.f32 %v593_v31, %v360_v30 }
  0x91   : > { %v367_v34 = vmul.f32 0.01, %v361_v32  ;;  %vm365_vm1 = vcmp.gt.f32.partialorder %v361_v32, 0.0 }
  0x93   : > { %v369_v37 = vsel %vm365_vm1, %v361_v32, %v367_v34 }
  0x96   : > { %v362_v33 = vpop.f32.mrf.mxu0 }
  0x97   : > { %v363_v35 = vadd.f32 %v593_v31, %v362_v33 }
  0x99   : > { %v368_v36 = vmul.f32 0.01, %v363_v35  ;;  %vm366_vm2 = vcmp.gt.f32.partialorder %v363_v35, 0.0 }
  0x9b   : > { %v370_v38 = vsel %vm366_vm2, %v363_v35, %v368_v36 }
  0x9c   : > { %v371_v39 = vpack.c.bf16 %v370_v38, %v369_v37 }
  0x9e   : > { %408 = vmatmul.bf16.vlgmr.msra.gmra.mxu1 %v371_v39 }
 0x11b   : > { %v409_v52 = vpop.f32.mrf.mxu1 }
 0x11c   : > { %v410_v54 = vadd.f32 %v594_v53, %v409_v52 }
 0x11e   : > { %v416_v56 = vmul.f32 0.01, %v410_v54  ;;  %vm414_vm3 = vcmp.gt.f32.partialorder %v410_v54, 0.0 }
 0x120   : > { %v418_v59 = vsel %vm414_vm3, %v410_v54, %v416_v56 }
 0x123   : > { %v411_v55 = vpop.f32.mrf.mxu1 }
 0x124   : > { %v412_v57 = vadd.f32 %v594_v53, %v411_v55 }
 0x126   : > { %vm415_vm4 = vcmp.gt.f32.partialorder %v412_v57, 0.0  ;;  %v417_v58 = vmul.f32 0.01, %v412_v57 }
 0x128   : > { %v419_v60 = vsel %vm415_vm4, %v412_v57, %v417_v58 }
 0x129   : > { %v420_v61 = vpack.c.bf16 %v419_v60, %v418_v59 }
 0x12b   : > { %581 = vmatmul.msk.bf16.vlgmr.msra.gmra.mxu2 %vm437_vm5, %v420_v61 }
 0x1ae   : > { %v450_v4 = vpop.f32.mrf.mxu2 }
 0x1af   : > { %v451_v6 = vadd.f32 %v595_v5, %v450_v4 }
 0x1b1   : > { %v457_v8 = vmul.f32 0.01, %v451_v6  ;;  %vm455_vm6 = vcmp.gt.f32.partialorder %v451_v6, 0.0 }
 0x1b3   : > { %v459_v11 = vsel %vm455_vm6, %v451_v6, %v457_v8 }
 0x1b6   : > { %v452_v7 = vpop.f32.mrf.mxu2 }
 0x1b7   : > { %v453_v9 = vadd.f32 %v595_v5, %v452_v7 }
 0x1b9   : > { %vm456_vm7 = vcmp.gt.f32.partialorder %v453_v9, 0.0  ;;  %v458_v10 = vmul.f32 0.01, %v453_v9 }
 0x1bb   : > { %v460_v12 = vsel %vm456_vm7, %v453_v9, %v458_v10 }
 0x1bc   : > { %v461_v13 = vpack.c.bf16 %v460_v12, %v459_v11 }
 0x1be   : > { %582 = vmatmul.msk.bf16.vlgmr.msra.gmra.mxu3 %vm472_vm8, %v461_v13 }
 0x241   : > { %v485_v15 = vpop.f32.mrf.mxu3 }
 0x242   : > { %v486_v16 = vadd.f32 %v596_v14, %v485_v15 }
 0x244   : > { %v491_v17 = vsel %vm490_vm9, %v486_v16, -inf }
 0x245   : > { %492 = vmax.xlane.f32.xlu0 %v491_v17 }
 0x249   : > { %v487_v18 = vpop.f32.mrf.mxu3 }
 0x24a   : > { %v488_v19 = vadd.f32 %v596_v14, %v487_v18 }
 0x24c   : > { %v494_v20 = vsel %vm490_vm9, %v488_v19, -inf }
 0x24d   : > { %495 = vmax.xlane.f32.xlu0 %v494_v20 }
 0x2b8   : > { %v493_v21 = vpop.xlane.xlu0 %492 }
 0x2b9   : > { %v497_v22 = vsub.f32 %v486_v16, %v493_v21 }
 0x2bb   : > { %v499_v23 = vmul.f32 1.442695, %v497_v22 }
 0x2bd   : > { %597 = vpow2.f32 %v499_v23 }
 0x2c0   : > { %v496_v24 = vpop.xlane.xlu0 %495 }
 0x2c1   : > { %v498_v25 = vsub.f32 %v488_v19, %v496_v24 }
 0x2c3   : > { %v598_v26 = vpop.eup %597  ;;  %v501_v27 = vmul.f32 1.442695, %v498_v25 }
 0x2c4   : > { %v503_v28 = vsel %vm490_vm9, %v598_v26, 0.0 }
 0x2c5   : > { %599 = vpow2.f32 %v501_v27  ;;  %504 = vadd.xlane.f32.xlu1 %v503_v28 }
 0x2cb   : > { %v600_v29 = vpop.eup %599 }
 0x2cc   : > { %v506_v30 = vsel %vm490_vm9, %v600_v29, 0.0 }
 0x2cd   : > { %507 = vadd.xlane.f32.xlu1 %v506_v30 }
 0x338   : > { %v505_v31 = vpop.xlane.xlu1 %504 }
 0x339   : > { %601 = vrcp.f32 %v505_v31 }
 0x33f   : > { %v602_v32 = vpop.eup %601 }
 0x340   : > { %v511_v33 = vmul.f32 %v602_v32, %v598_v26  ;;  %v508_v34 = vpop.xlane.xlu1 %507 }
 0x341   : > { %603 = vrcp.f32 %v508_v34 }
 0x342   : > { %513 = vst.msk [vmem:[%s334_s12] sm:$0xff] %vm490_vm9, %v511_v33 }
 0x347   : > { %v604_v35 = vpop.eup %603 }
 0x348   : > { %v512_v36 = vmul.f32 %v604_v35, %v600_v29 }
 0x34a   : > { %514 = vst.msk [vmem:[%s334_s12 + $0x8] sm:$0xff] %vm490_vm9, %v512_v36 }
 0x34b PF: > { %s19_s30 = sadd.s32 1, %s611_s30  }
 0x34c   : > { %p16_p4 = scmp.ge.s32.totalorder %s19_s30, 5  }
 0x34e   :  { %18 = sbr.rel (!%p16_p4) target bundleno = 1 (0x1), region = 86 }

</bundles_post_ra>
